<compile_context>
chip_gen: v7x
topology: tpu7x:2x2x1
jax: 0.10.0
libtpu: 0.0.40
codegen_flags: <defaults>
</compile_context>

<pallas_src>
import functools

import numpy as np
import jax
import jax.numpy as jnp
from jax.experimental import pallas as pl
from jax.experimental.pallas import tpu as pltpu

EPS = 1e-5  # nn.BatchNorm1d default eps

# Row indices in the packed parameter table (one vector per sublane row).
R_B1, R_G1, R_BE1, R_B2, R_G2, R_BE2, R_BH = 0, 1, 2, 3, 4, 5, 6


def naf_forward_kernel(state_ref, action_ref, noise_ref, prow_ref,
                       w1_ref, w2_ref, wh_ref, out_ref, *, A, H):
    state = state_ref[...]                  # (B, S)  f32
    act = action_ref[...]                   # (B, A)  f32
    noise = noise_ref[...]                  # (1, A)  f32

    prow = prow_ref[...]                    # (8, P)  f32, lane-aligned rows
    b1 = prow[R_B1:R_B1 + 1, :H]
    g1 = prow[R_G1:R_G1 + 1, :H]
    be1 = prow[R_BE1:R_BE1 + 1, :H]
    b2 = prow[R_B2:R_B2 + 1, :H]
    g2 = prow[R_G2:R_G2 + 1, :H]
    be2 = prow[R_BE2:R_BE2 + 1, :H]
    bh = prow[R_BH:R_BH + 1, :2 * A + 1]

    # ---- layer 1: Linear -> ReLU -> BatchNorm1d (training mode, batch stats) ----
    h1 = jnp.maximum(
        jnp.dot(state.astype(jnp.bfloat16), w1_ref[...],
                preferred_element_type=jnp.float32) + b1, 0.0)
    m1 = jnp.mean(h1, axis=0, keepdims=True)
    v1 = jnp.mean(h1 * h1, axis=0, keepdims=True) - m1 * m1   # biased variance
    s1 = g1 * jax.lax.rsqrt(v1 + EPS)
    h1 = h1 * s1 + (be1 - m1 * s1)                            # fused BN affine

    # ---- layer 2: Linear -> ReLU -> BatchNorm1d ----
    h2 = jnp.maximum(
        jnp.dot(h1.astype(jnp.bfloat16), w2_ref[...],
                preferred_element_type=jnp.float32) + b2, 0.0)
    m2 = jnp.mean(h2, axis=0, keepdims=True)
    v2 = jnp.mean(h2 * h2, axis=0, keepdims=True) - m2 * m2
    s2 = g2 * jax.lax.rsqrt(v2 + EPS)
    h2 = h2 * s2 + (be2 - m2 * s2)

    # ---- fused heads: one MXU pass producing [mu_pre | l_diag_pre | value] ----
    heads = jnp.dot(h2.astype(jnp.bfloat16), wh_ref[...],
                    preferred_element_type=jnp.float32) + bh
    mu = jnp.tanh(heads[:, :A])                    # (B, A)
    l_diag = jnp.tanh(heads[:, A:2 * A])           # (B, A) diagonal entries of L
    value = heads[:, 2 * A:2 * A + 1]              # (B, 1)

    # P = L ∘ L^T (elementwise, as the PyTorch source literally does) is diagonal:
    # diagonal of L is exp(tanh(pre)) => P_ii = exp(2 * tanh(pre_i)).
    p_diag = jnp.exp(2.0 * l_diag)
    diff = act - mu
    advantage = -0.5 * jnp.sum(p_diag * diff * diff, axis=-1, keepdims=True)  # (B, 1)
    q = advantage + value

    # Single lane-dense padded store: [action | mu | Q | V | zeros] -> (B, out_pad)
    B = out_ref.shape[0]
    pad = out_ref.shape[1] - (2 * A + 2)
    out_ref[...] = jnp.concatenate(
        [mu + noise, mu, q, value, jnp.zeros((B, pad), jnp.float32)], axis=-1)


def pack_params(params, action_size):
    """One-time packing of the parameter dict into the fused kernel layout."""
    A = action_size
    H = params["w1"].shape[1]

    # Row-major lower-triangular packing (torch.tril_indices): diagonal positions.
    diag_idx = np.array([r * (r + 1) // 2 + r for r in range(A)], dtype=np.int32)
    wl_diag = params["wl"][:, diag_idx]            # (H, A)
    bl_diag = params["bl"][:, diag_idx]            # (1, A)
    w_heads = jnp.concatenate([params["wmu"], wl_diag, params["wv"]], axis=1)  # (H, 2A+1)

    # One vector per sublane row, each starting at lane 0 (lane-aligned slices).
    P = int(-(-max(H, 2 * A + 1) // 128)) * 128

    def pad_row(v):
        v = jnp.asarray(v, jnp.float32).reshape(1, -1)
        return jnp.pad(v, ((0, 0), (0, P - v.shape[1])))

    prow = jnp.concatenate(
        [pad_row(params["b1"]), pad_row(params["g1"]), pad_row(params["be1"]),
         pad_row(params["b2"]), pad_row(params["g2"]), pad_row(params["be2"]),
         pad_row(jnp.concatenate([params["bmu"], bl_diag, params["bv"]], axis=1)),
         jnp.zeros((1, P), jnp.float32)],           # pad to 8 sublane rows
        axis=0)                                      # (8, P)

    return {
        "w1": params["w1"].astype(jnp.bfloat16),
        "w2": params["w2"].astype(jnp.bfloat16),
        "w_heads": w_heads.astype(jnp.bfloat16),
        "prow": prow,
    }


@jax.jit
def naf_forward(state, action, noise, packed):
    """Run the NAF forward Pallas kernel.

    state:  (B, S) float32
    action: (B, A) float32
    noise:  (1, A) float32  (pre-scaled exploration noise, 0.3 * max_action * N(0,1))
    packed: dict from pack_params()
    Returns (action_out, Q, Value, mu).
    """
    B, S = state.shape
    A = action.shape[1]
    H = packed["w1"].shape[1]
    out_pad = int(-(-(2 * A + 2) // 128)) * 128      # lane-dense output width

    # TODO(synk): for replay-buffer-sized B, add a batch grid with a two-pass
    # BatchNorm reduction (sum/sum-of-squares scratch) and PARALLEL semantics;
    # single-block is correct and fastest at these small shapes.
    vmem = pl.BlockSpec(memory_space=pltpu.MemorySpace.VMEM)
    out = pl.pallas_call(
        functools.partial(naf_forward_kernel, A=A, H=H),
        out_shape=jax.ShapeDtypeStruct((B, out_pad), jnp.float32),
        in_specs=[vmem] * 7,
        out_specs=vmem,
    )(state, action, noise, packed["prow"],
      packed["w1"], packed["w2"], packed["w_heads"])

    action_out = out[:, :A]
    mu = out[:, A:2 * A]
    q = out[:, 2 * A:2 * A + 1]
    value = out[:, 2 * A + 1:2 * A + 2]
    return action_out, q, value, mu


def init_params(key, state_shape, action_size, hidden_dims):
    """Deterministic synthetic parameter init (PyTorch-style uniform(-1/sqrt(fan_in), ...)).

    Weights are stored as (in_features, out_features) so y = x @ W + b.
    """
    nL = action_size * (action_size + 1) // 2

    def linear(key, fan_in, fan_out):
        kw, kb = jax.random.split(key)
        bound = 1.0 / jnp.sqrt(float(fan_in))
        w = jax.random.uniform(kw, (fan_in, fan_out), jnp.float32, -bound, bound)
        b = jax.random.uniform(kb, (1, fan_out), jnp.float32, -bound, bound)
        return w, b

    k1, k2, k3, k4, k5 = jax.random.split(key, 5)
    w1, b1 = linear(k1, state_shape, hidden_dims)
    w2, b2 = linear(k2, hidden_dims, hidden_dims)
    wmu, bmu = linear(k3, hidden_dims, action_size)
    wl, bl = linear(k4, hidden_dims, nL)
    wv, bv = linear(k5, hidden_dims, 1)

    return {
        "w1": w1, "b1": b1,
        "g1": jnp.ones((1, hidden_dims), jnp.float32),
        "be1": jnp.zeros((1, hidden_dims), jnp.float32),
        "w2": w2, "b2": b2,
        "g2": jnp.ones((1, hidden_dims), jnp.float32),
        "be2": jnp.zeros((1, hidden_dims), jnp.float32),
        "wmu": wmu, "bmu": bmu,
        "wl": wl, "bl": bl,
        "wv": wv, "bv": bv,
    }


if __name__ == "__main__":
    # Small shapes consistent with the module's forward.
    B, S, A, H = 8, 8, 4, 32
    max_action = 1.0

    key = jax.random.PRNGKey(0)
    k_state, k_action, k_noise, k_params = jax.random.split(key, 4)

    state = jax.random.normal(k_state, (B, S), jnp.float32)
    action_in = jax.random.uniform(k_action, (B, A), jnp.float32, -1.0, 1.0)
    # expl_noise * randn(action_size), broadcast over the batch inside the kernel
    # (matches the PyTorch source: one noise vector shared across the batch).
    noise = (0.3 * max_action * jax.random.normal(k_noise, (A,), jnp.float32)).reshape(1, A)

    params = init_params(k_params, S, A, H)
    packed = pack_params(params, A)   # one-time packing, outside the hot path

    # TODO(synk): BatchNorm running_mean/running_var updates are not modeled
    # (pure forward pass with batch statistics, as the module's forward uses).
    action_out, Q, Value, mu = naf_forward(state, action_in, noise, packed)
    jax.block_until_ready((action_out, Q, Value, mu))

    assert action_out.shape == (B, A)
    assert Q.shape == (B, 1)
    assert Value.shape == (B, 1)
    assert mu.shape == (B, A)
    assert bool(jnp.all(jnp.isfinite(Q)))
    assert bool(jnp.all(jnp.isfinite(action_out)))

    print("KERNEL_OK")
</pallas_src>

<mosaic_0001>
module attributes {stable_mosaic.version = 11 : i64} {
  func.func @naf_forward_kernel(%arg0: memref<8x8xf32, #tpu.memory_space<vmem>>, %arg1: memref<8x4xf32, #tpu.memory_space<vmem>>, %arg2: memref<1x4xf32, #tpu.memory_space<vmem>>, %arg3: memref<8x128xf32, #tpu.memory_space<vmem>>, %arg4: memref<8x32xbf16, #tpu.memory_space<vmem>>, %arg5: memref<32x32xbf16, #tpu.memory_space<vmem>>, %arg6: memref<32x9xbf16, #tpu.memory_space<vmem>>, %arg7: memref<8x128xf32, #tpu.memory_space<vmem>>) attributes {dimension_semantics = [], scalar_prefetch = 0 : i64, scratch_operands = 0 : i64, tpu.core_type = #tpu.core_type<tc>} {
    %c0 = arith.constant 0 : index
    %c0_0 = arith.constant 0 : index
    %0 = vector.load %arg0[%c0, %c0_0] : memref<8x8xf32, #tpu.memory_space<vmem>>, vector<8x8xf32>
    %c0_1 = arith.constant 0 : index
    %c0_2 = arith.constant 0 : index
    %1 = vector.load %arg1[%c0_1, %c0_2] : memref<8x4xf32, #tpu.memory_space<vmem>>, vector<8x4xf32>
    %c0_3 = arith.constant 0 : index
    %c0_4 = arith.constant 0 : index
    %2 = vector.load %arg2[%c0_3, %c0_4] : memref<1x4xf32, #tpu.memory_space<vmem>>, vector<1x4xf32>
    %c0_5 = arith.constant 0 : index
    %c0_6 = arith.constant 0 : index
    %3 = vector.load %arg3[%c0_5, %c0_6] : memref<8x128xf32, #tpu.memory_space<vmem>>, vector<8x128xf32>
    %4 = vector.extract_strided_slice %3 {offsets = [0, 0], sizes = [1, 32], strides = [1, 1]} : vector<8x128xf32> to vector<1x32xf32>
    %5 = vector.extract_strided_slice %3 {offsets = [1, 0], sizes = [1, 32], strides = [1, 1]} : vector<8x128xf32> to vector<1x32xf32>
    %6 = vector.extract_strided_slice %3 {offsets = [2, 0], sizes = [1, 32], strides = [1, 1]} : vector<8x128xf32> to vector<1x32xf32>
    %7 = vector.extract_strided_slice %3 {offsets = [3, 0], sizes = [1, 32], strides = [1, 1]} : vector<8x128xf32> to vector<1x32xf32>
    %8 = vector.extract_strided_slice %3 {offsets = [4, 0], sizes = [1, 32], strides = [1, 1]} : vector<8x128xf32> to vector<1x32xf32>
    %9 = vector.extract_strided_slice %3 {offsets = [5, 0], sizes = [1, 32], strides = [1, 1]} : vector<8x128xf32> to vector<1x32xf32>
    %10 = vector.extract_strided_slice %3 {offsets = [6, 0], sizes = [1, 9], strides = [1, 1]} : vector<8x128xf32> to vector<1x9xf32>
    %11 = arith.truncf %0 : vector<8x8xf32> to vector<8x8xbf16>
    %c0_7 = arith.constant 0 : index
    %c0_8 = arith.constant 0 : index
    %12 = vector.load %arg4[%c0_7, %c0_8] : memref<8x32xbf16, #tpu.memory_space<vmem>>, vector<8x32xbf16>
    %cst = arith.constant dense<0.000000e+00> : vector<8x32xf32>
    %13 = tpu.matmul %11, %12, %cst {dimension_numbers = #tpu.dot_dimension_numbers<[1], [0], [0], [1], [0, 0, 1, 1], [], []>} : vector<8x8xbf16>, vector<8x32xbf16>, vector<8x32xf32> -> vector<8x32xf32>
    %14 = vector.broadcast %4 : vector<1x32xf32> to vector<8x32xf32>
    %15 = arith.addf %13, %14 : vector<8x32xf32>
    %cst_9 = arith.constant 0.000000e+00 : f32
    %16 = vector.broadcast %cst_9 : f32 to vector<8x32xf32>
    %17 = arith.maximumf %15, %16 : vector<8x32xf32>
    %cst_10 = arith.constant dense<0.000000e+00> : vector<32xf32>
    %18 = vector.multi_reduction <add>, %17, %cst_10 [0] : vector<8x32xf32> to vector<32xf32>
    %19 = vector.shape_cast %18 : vector<32xf32> to vector<1x32xf32>
    %cst_11 = arith.constant 8.000000e+00 : f32
    %20 = vector.broadcast %cst_11 : f32 to vector<1x32xf32>
    %21 = arith.divf %19, %20 : vector<1x32xf32>
    %22 = arith.mulf %17, %17 : vector<8x32xf32>
    %cst_12 = arith.constant dense<0.000000e+00> : vector<32xf32>
    %23 = vector.multi_reduction <add>, %22, %cst_12 [0] : vector<8x32xf32> to vector<32xf32>
    %24 = vector.shape_cast %23 : vector<32xf32> to vector<1x32xf32>
    %cst_13 = arith.constant 8.000000e+00 : f32
    %25 = vector.broadcast %cst_13 : f32 to vector<1x32xf32>
    %26 = arith.divf %24, %25 : vector<1x32xf32>
    %27 = arith.mulf %21, %21 : vector<1x32xf32>
    %28 = arith.subf %26, %27 : vector<1x32xf32>
    %cst_14 = arith.constant 9.99999974E-6 : f32
    %29 = vector.broadcast %cst_14 : f32 to vector<1x32xf32>
    %30 = arith.addf %28, %29 : vector<1x32xf32>
    %31 = math.rsqrt %30 : vector<1x32xf32>
    %32 = arith.mulf %5, %31 : vector<1x32xf32>
    %33 = vector.broadcast %32 : vector<1x32xf32> to vector<8x32xf32>
    %34 = arith.mulf %17, %33 : vector<8x32xf32>
    %35 = arith.mulf %21, %32 : vector<1x32xf32>
    %36 = arith.subf %6, %35 : vector<1x32xf32>
    %37 = vector.broadcast %36 : vector<1x32xf32> to vector<8x32xf32>
    %38 = arith.addf %34, %37 : vector<8x32xf32>
    %39 = arith.truncf %38 : vector<8x32xf32> to vector<8x32xbf16>
    %c0_15 = arith.constant 0 : index
    %c0_16 = arith.constant 0 : index
    %40 = vector.load %arg5[%c0_15, %c0_16] : memref<32x32xbf16, #tpu.memory_space<vmem>>, vector<32x32xbf16>
    %cst_17 = arith.constant dense<0.000000e+00> : vector<8x32xf32>
    %41 = tpu.matmul %39, %40, %cst_17 {dimension_numbers = #tpu.dot_dimension_numbers<[1], [0], [0], [1], [0, 0, 1, 1], [], []>} : vector<8x32xbf16>, vector<32x32xbf16>, vector<8x32xf32> -> vector<8x32xf32>
    %42 = vector.broadcast %7 : vector<1x32xf32> to vector<8x32xf32>
    %43 = arith.addf %41, %42 : vector<8x32xf32>
    %cst_18 = arith.constant 0.000000e+00 : f32
    %44 = vector.broadcast %cst_18 : f32 to vector<8x32xf32>
    %45 = arith.maximumf %43, %44 : vector<8x32xf32>
    %cst_19 = arith.constant dense<0.000000e+00> : vector<32xf32>
    %46 = vector.multi_reduction <add>, %45, %cst_19 [0] : vector<8x32xf32> to vector<32xf32>
    %47 = vector.shape_cast %46 : vector<32xf32> to vector<1x32xf32>
    %cst_20 = arith.constant 8.000000e+00 : f32
    %48 = vector.broadcast %cst_20 : f32 to vector<1x32xf32>
    %49 = arith.divf %47, %48 : vector<1x32xf32>
    %50 = arith.mulf %45, %45 : vector<8x32xf32>
    %cst_21 = arith.constant dense<0.000000e+00> : vector<32xf32>
    %51 = vector.multi_reduction <add>, %50, %cst_21 [0] : vector<8x32xf32> to vector<32xf32>
    %52 = vector.shape_cast %51 : vector<32xf32> to vector<1x32xf32>
    %cst_22 = arith.constant 8.000000e+00 : f32
    %53 = vector.broadcast %cst_22 : f32 to vector<1x32xf32>
    %54 = arith.divf %52, %53 : vector<1x32xf32>
    %55 = arith.mulf %49, %49 : vector<1x32xf32>
    %56 = arith.subf %54, %55 : vector<1x32xf32>
    %cst_23 = arith.constant 9.99999974E-6 : f32
    %57 = vector.broadcast %cst_23 : f32 to vector<1x32xf32>
    %58 = arith.addf %56, %57 : vector<1x32xf32>
    %59 = math.rsqrt %58 : vector<1x32xf32>
    %60 = arith.mulf %8, %59 : vector<1x32xf32>
    %61 = vector.broadcast %60 : vector<1x32xf32> to vector<8x32xf32>
    %62 = arith.mulf %45, %61 : vector<8x32xf32>
    %63 = arith.mulf %49, %60 : vector<1x32xf32>
    %64 = arith.subf %9, %63 : vector<1x32xf32>
    %65 = vector.broadcast %64 : vector<1x32xf32> to vector<8x32xf32>
    %66 = arith.addf %62, %65 : vector<8x32xf32>
    %67 = arith.truncf %66 : vector<8x32xf32> to vector<8x32xbf16>
    %c0_24 = arith.constant 0 : index
    %c0_25 = arith.constant 0 : index
    %68 = vector.load %arg6[%c0_24, %c0_25] : memref<32x9xbf16, #tpu.memory_space<vmem>>, vector<32x9xbf16>
    %cst_26 = arith.constant dense<0.000000e+00> : vector<8x9xf32>
    %69 = tpu.matmul %67, %68, %cst_26 {dimension_numbers = #tpu.dot_dimension_numbers<[1], [0], [0], [1], [0, 0, 1, 1], [], []>} : vector<8x32xbf16>, vector<32x9xbf16>, vector<8x9xf32> -> vector<8x9xf32>
    %70 = vector.broadcast %10 : vector<1x9xf32> to vector<8x9xf32>
    %71 = arith.addf %69, %70 : vector<8x9xf32>
    %72 = vector.extract_strided_slice %71 {offsets = [0, 0], sizes = [8, 4], strides = [1, 1]} : vector<8x9xf32> to vector<8x4xf32>
    %73 = math.tanh %72 : vector<8x4xf32>
    %74 = vector.extract_strided_slice %71 {offsets = [0, 4], sizes = [8, 4], strides = [1, 1]} : vector<8x9xf32> to vector<8x4xf32>
    %75 = math.tanh %74 : vector<8x4xf32>
    %76 = vector.extract_strided_slice %71 {offsets = [0, 8], sizes = [8, 1], strides = [1, 1]} : vector<8x9xf32> to vector<8x1xf32>
    %cst_27 = arith.constant 2.000000e+00 : f32
    %77 = vector.broadcast %cst_27 : f32 to vector<8x4xf32>
    %78 = arith.mulf %77, %75 : vector<8x4xf32>
    %79 = math.exp %78 : vector<8x4xf32>
    %80 = arith.subf %1, %73 : vector<8x4xf32>
    %81 = arith.mulf %79, %80 : vector<8x4xf32>
    %82 = arith.mulf %81, %80 : vector<8x4xf32>
    %cst_28 = arith.constant dense<0.000000e+00> : vector<8xf32>
    %83 = vector.multi_reduction <add>, %82, %cst_28 [1] : vector<8x4xf32> to vector<8xf32>
    %84 = vector.shape_cast %83 : vector<8xf32> to vector<8x1xf32>
    %cst_29 = arith.constant -5.000000e-01 : f32
    %85 = vector.broadcast %cst_29 : f32 to vector<8x1xf32>
    %86 = arith.mulf %85, %84 : vector<8x1xf32>
    %87 = arith.addf %86, %76 : vector<8x1xf32>
    %88 = vector.broadcast %2 : vector<1x4xf32> to vector<8x4xf32>
    %89 = arith.addf %73, %88 : vector<8x4xf32>
    %cst_30 = arith.constant 0.000000e+00 : f32
    %90 = vector.broadcast %cst_30 : f32 to vector<8x118xf32>
    %91 = tpu.concatenate %89, %73, %87, %76, %90 in 1 : vector<8x4xf32>, vector<8x4xf32>, vector<8x1xf32>, vector<8x1xf32>, vector<8x118xf32> -> vector<8x128xf32>
    %c0_31 = arith.constant 0 : index
    %c0_32 = arith.constant 0 : index
    %92 = vector.load %arg7[%c0_31, %c0_32] : memref<8x128xf32, #tpu.memory_space<vmem>>, vector<8x128xf32>
    tpu.vector_store %arg7[%c0_31, %c0_32], %91 {strides = array<i32>} : memref<8x128xf32, #tpu.memory_space<vmem>>, vector<8x128xf32>,
    return
  }
}

</mosaic_0001>

<bundles_post_ra>
// kernel: naf_forward.1
= control target key start
LH: loop header
LB: loop body
LE: loop exit
PB: predicated region body
PF: predicated region fallthrough
CT: control target
= control target key end

     0   :  { %vm41_vm0 = vcmask 1043456   ;;  %v393_v0 = vmov 0.0   ;;  %vm394_vm1 = vmmov 0   ;;  %vm37_vm2 = vcmask 64512   ;;  %s395_s12 = smov 4   ;;  %s396_s13 = smov 124   ;;  %s502_s4 = inlined_call_operand.vmem [shape: bf16[8,32], index: 4, kind: input, shape index: {}]   ;;  %s503_s0 = inlined_call_operand.vmem [shape: f32[8,8], index: 0, kind: input, shape index: {}]   ;;  %s504_s5 = inlined_call_operand.vmem [shape: bf16[32,32], index: 5, kind: input, shape index: {}]   ;;  %s505_s3 = inlined_call_operand.vmem [shape: f32[8,128], index: 3, kind: input, shape index: {}]   ;;  %s506_s6 = inlined_call_operand.vmem [shape: bf16[32,9], index: 6, kind: input, shape index: {}]   ;;  %s507_s1 = inlined_call_operand.vmem [shape: f32[8,4], index: 1, kind: input, shape index: {}]   ;;  %s508_s2 = inlined_call_operand.vmem [shape: f32[1,4], index: 2, kind: input, shape index: {}]   ;;  %s509_s7 = inlined_call_operand.vmem [shape: f32[8,128], index: 7, kind: output, shape index: {}]  }
   0x1   :  { %354 = vmatprep.subr.bf16.mxu0 %v393_v0  ;;  %v32_v1 = vld [vmem:[%s502_s4] sm:$0xf]  ;;  %356 = vmatprep.mubr.msk.bf16.mxu0 %vm394_vm1, %v393_v0  ;;  %v382_v6 = vld [vmem:[%s504_s5 + $0x8] sm:$0xff]   ;;  %v33_v7 = vlaneseq  ;;  %vm86_vm3 = vcmask 261120   ;;  %s397_s14 = smov 1   ;;  %vm306_vm4 = vcmask 31744  }
   0x2   :  { %v27_v2 = vld [vmem:[%s503_s0] sm:$0xff]  ;;  %v43_v3 = vsel %vm41_vm0, %v32_v1, 0  ;;  %360 = vmatprep.subr.bf16.mxu1 %v393_v0  ;;  %364 = vmatprep.mubr.msk.bf16.mxu1 %vm394_vm1, %v393_v0  ;;  %v384_v51 = vld [vmem:[%s506_s6 + $0x8] sm:$0xff]   ;;  %vm329_vm5 = vcmask 72704   ;;  %vm331_vm6 = vcmask 80896  }
   0x3   :  { %v31_v4 = vpack.c.bf16 %v27_v2, %v27_v2  ;;  %355 = vmatpush3.bf16.msra.mxu0 %v43_v3  ;;  %v381_v5 = vld [vmem:[%s504_s5] sm:$0xff]   ;;  %v458_v8 = vshrl.u32 %v33_v7, 7 }
   0x4   :  { %368 = vmatprep.subr.bf16.mxu0 %v393_v0  ;;  %361 = vmatpush3.bf16.msra.mxu1 %v381_v5  ;;  %v464_v10 = vld [vmem:[%s505_s3] sm:$0xff] }
   0x5   :  { %362 = vmatprep.subr.bf16.mxu1 %v393_v0  ;;  %v35_v9 = vsub.s32 0, %v458_v8  ;;  %v112_v40 = vsub.s32 1, %v458_v8  ;;  %v122_v44 = vsub.s32 2, %v458_v8  ;;  %v383_v50 = vld [vmem:[%s506_s6] sm:$0xff]   ;;  %v132_v52 = vsub.s32 3, %v458_v8 }
   0x6   :  { %357 = vmatmul.mubr.msk.bf16.vlgmr.msra.gmra.mrb[0].mxu0 %vm37_vm2, %v31_v4 }
   0x7   :  { %372 = vmatprep.mubr.msk.bf16.mxu0 %vm394_vm1, %v393_v0  ;;  %v36_v11 = vrot.slane %v464_v10, %v35_v9  ;;  %369 = vmatpush3.bf16.msra.mxu0 %v383_v50  ;;  %v133_v53 = vrot.slane %v464_v10, %v132_v52 }
   0x8   :  { %363 = vmatpush3.bf16.msra.mxu1 %v382_v6  ;;  %370 = vmatprep.subr.bf16.mxu0 %v393_v0 }
   0xb   :  { %371 = vmatpush3.bf16.msra.mxu0 %v384_v51 }
  0xd9   :  { %v79_v12 = vpop.f32.mrb[0].mxu0 }
  0xda   :  { %v80_v13 = vadd.f32 %v79_v12, %v36_v11  ;;  %v358_v14 = vpop.f32.mrb[1].mxu0 }
  0xdb   :  { %v82_v15 = vpop.f32.mrb[2].mxu0 }
  0xdc   :  { %v85_v16 = vmax.f32 %v80_v13, 0.0  ;;  %v359_v17 = vpop.f32.mrb[3].mxu0 }
  0xde   :  { %v87_v18 = vsel %vm86_vm3, %v85_v16, 0.0  ;;  %v96_v19 = vmul.f32 %v85_v16, %v85_v16 }
  0xdf   :  { %v88_v20 = vrot.slane %v87_v18, 4 }
  0xe0   :  { %v97_v21 = vsel %vm86_vm3, %v96_v19, 0.0 }
  0xe1   :  { %v89_v22 = vadd.f32 %v88_v20, %v87_v18  ;;  %v98_v23 = vrot.slane %v97_v21, 4  ;;  %v214_v20 = vsub.s32 4, %v458_v8 }
  0xe3   :  { %v90_v24 = vrot.slane %v89_v22, 2  ;;  %v99_v25 = vadd.f32 %v98_v23, %v97_v21 }
  0xe5   :  { %v91_v26 = vadd.f32 %v90_v24, %v89_v22  ;;  %v100_v27 = vrot.slane %v99_v25, 2  ;;  %v224_v24 = vsub.s32 5, %v458_v8 }
  0xe7   :  { %v92_v28 = vrot.slane %v91_v26, 1  ;;  %v101_v29 = vadd.f32 %v100_v27, %v99_v25 }
  0xe9   :  { %v93_v30 = vadd.f32 %v92_v28, %v91_v26  ;;  %v102_v31 = vrot.slane %v101_v29, 1 }
  0xeb   :  { %v95_v32 = vmul.f32 0.125, %v93_v30  ;;  %v103_v33 = vadd.f32 %v102_v31, %v101_v29  ;;  %v234_v30 = vsub.s32 6, %v458_v8 }
  0xed   :  { %v104_v34 = vmul.f32 0.125, %v103_v33  ;;  %v105_v35 = vmul.f32 %v95_v32, %v95_v32  ;;  %v235_v31 = vrot.slane %v464_v10, %v234_v30 }
  0xef   :  { %v106_v36 = vsub.f32 %v104_v34, %v105_v35 }
  0xf1   :  { %v107_v37 = vadd.f32 1e-05, %v106_v36 }
  0xf3   :  { %385 = vrsqrt.f32 %v107_v37  ;;  %v28_v37 = vld [vmem:[%s507_s1] sm:$0xff] }
  0xfd   :  { %v386_v38 = vpop.eup %385 }
  0xfe   :  { %v109_v39 = vmul.f32 %v386_v38, %v464_v10 }
 0x100   :  { %v115_v41 = vmul.f32 %v109_v39, %v95_v32  ;;  %v113_v42 = vrot.slane %v109_v39, %v112_v40 }
 0x102   :  { %v117_v43 = vrot.slane %v115_v41, 7  ;;  %v114_v46 = vmul.f32 %v113_v42, %v85_v16 }
 0x104   :  { %v119_v45 = vsub.f32 %v464_v10, %v117_v43 }
 0x106   :  { %v123_v47 = vrot.slane %v119_v45, %v122_v44 }
 0x108   :  { %v124_v48 = vadd.f32 %v123_v47, %v114_v46  ;;  %v345_v47 = vld [vmem:[%s508_s2] ss:$0 sm:$0xff] }
 0x10a   :  { %v125_v49 = vpack.c.bf16 %v124_v48, %v124_v48 }
 0x10c   :  { %365 = vmatmul.mubr.msk.bf16.vlgmr.msra.gmra.mrb[0].mxu1 %vm86_vm3, %v125_v49 }
 0x1df   :  { %v183_v54 = vpop.f32.mrb[0].mxu1 }
 0x1e0   :  { %v184_v55 = vadd.f32 %v183_v54, %v133_v53  ;;  %v366_v56 = vpop.f32.mrb[1].mxu1 }
 0x1e1   :  { %v186_v57 = vpop.f32.mrb[2].mxu1 }
 0x1e2   :  { %v189_v58 = vmax.f32 %v184_v55, 0.0  ;;  %v367_v59 = vpop.f32.mrb[3].mxu1 }
 0x1e4   :  { %v190_v60 = vsel %vm86_vm3, %v189_v58, 0.0  ;;  %v198_v61 = vmul.f32 %v189_v58, %v189_v58 }
 0x1e5   :  { %v191_v62 = vrot.slane %v190_v60, 4 }
 0x1e6   :  { %v199_v63 = vsel %vm86_vm3, %v198_v61, 0.0 }
 0x1e7   :  { %v192_v0 = vadd.f32 %v191_v62, %v190_v60  ;;  %v200_v1 = vrot.slane %v199_v63, 4 }
 0x1e9   :  { %v193_v2 = vrot.slane %v192_v0, 2  ;;  %v201_v3 = vadd.f32 %v200_v1, %v199_v63 }
 0x1eb   :  { %v194_v4 = vadd.f32 %v193_v2, %v192_v0  ;;  %v202_v5 = vrot.slane %v201_v3, 2 }
 0x1ed   :  { %v195_v6 = vrot.slane %v194_v4, 1  ;;  %v203_v7 = vadd.f32 %v202_v5, %v201_v3 }
 0x1ef   :  { %v196_v9 = vadd.f32 %v195_v6, %v194_v4  ;;  %v204_v11 = vrot.slane %v203_v7, 1 }
 0x1f1   :  { %v197_v12 = vmul.f32 0.125, %v196_v9  ;;  %v205_v13 = vadd.f32 %v204_v11, %v203_v7 }
 0x1f3   :  { %v206_v14 = vmul.f32 0.125, %v205_v13  ;;  %v207_v15 = vmul.f32 %v197_v12, %v197_v12 }
 0x1f5   :  { %v208_v16 = vsub.f32 %v206_v14, %v207_v15 }
 0x1f7   :  { %v209_v17 = vadd.f32 1e-05, %v208_v16 }
 0x1f9   :  { %387 = vrsqrt.f32 %v209_v17 }
 0x203   :  { %v388_v18 = vpop.eup %387 }
 0x204   :  { %v211_v19 = vmul.f32 %v388_v18, %v464_v10 }
 0x206   :  { %v217_v21 = vmul.f32 %v211_v19, %v197_v12  ;;  %v215_v22 = vrot.slane %v211_v19, %v214_v20 }
 0x208   :  { %v219_v23 = vrot.slane %v217_v21, 7  ;;  %v216_v26 = vmul.f32 %v215_v22, %v189_v58 }
 0x20a   :  { %v221_v25 = vsub.f32 %v464_v10, %v219_v23 }
 0x20c   :  { %v225_v27 = vrot.slane %v221_v25, %v224_v24 }
 0x20e   :  { %v226_v28 = vadd.f32 %v225_v27, %v216_v26 }
 0x210   :  { %v227_v29 = vpack.c.bf16 %v226_v28, %v226_v28 }
 0x212   :  { %373 = vmatmul.mubr.msk.bf16.vlgmr.msra.gmra.mrb[4].mxu0 %vm86_vm3, %v227_v29 }
 0x2e5   :  { %v285_v32 = vpop.f32.mrb[4].mxu0 }
 0x2e6   :  { %v286_v33 = vadd.f32 %v285_v32, %v235_v31  ;;  %v374_v34 = vpop.f32.mrb[5].mxu0 }
 0x2e7   :  { %v288_v35 = vpop.f32.mrb[6].mxu0 }
 0x2e8   :  { %389 = vtanh.f32 %v286_v33  ;;  %v375_v36 = vpop.f32.mrb[7].mxu0 }
 0x2f2   :  { %v390_v38 = vpop.eup %389 }
 0x2f3   :  { %v295_v39 = vsub.f32 %v28_v37, %v390_v38  ;;  %v292_v40 = vmul.f32 2.0, %v390_v38  ;;  %v318_v50 = vadd.f32 %v390_v38, %v345_v47 }
 0x2f5   :  { %297 = vrot.lane.b32.xlu0 %v295_v39, %s395_s12  ;;  %v293_v41 = vmul.f32 1.442695, %v292_v40 }
 0x2f7   :  { %391 = vpow2.f32 %v293_v41 }
 0x301   :  { %v392_v8 = vpop.eup %391 }
 0x367   :  { %v298_v42 = vpop.permute.xlu0 %297 }
 0x368   :  { %v300_v10 = vmul.f32 %v392_v8, %v298_v42 }
 0x36a   :  { %v301_v43 = vmul.f32 %v300_v10, %v298_v42 }
 0x36c   :  { %303 = vrot.lane.b32.xlu0 %v301_v43, %s396_s13 }
 0x370   :  { %324 = vrot.lane.b32.xlu0 %v286_v33, %s397_s14 }
 0x3de   :  { %v304_v44 = vpop.permute.xlu0 %303 }
 0x3df   :  { %v307_v45 = vsel %vm306_vm4, %v304_v44, 0.0 }
 0x3e0   :  { %308 = vadd.xlane.f32.xlu1 %v307_v45 }
 0x3e2   :  { %v325_v53 = vpop.permute.xlu0 %324 }
 0x3f1   :  { %320 = vrot.lane.b32.xlu1 %v390_v38, %s395_s12 }
 0x46d   :  { %v309_v46 = vpop.xlane.xlu1 %308 }
 0x46e   :  { %v310_v48 = vmul.f32 -0.5, %v309_v46 }
 0x470   :  { %v311_v49 = vadd.f32 %v310_v48, %v286_v33 }
 0x471   :  { %v321_v51 = vpop.permute.xlu1 %320 }
 0x472   :  { %v327_v52 = vsel %vm306_vm4, %v318_v50, %v321_v51 }
 0x473   :  { %v328_v54 = vsel %vm37_vm2, %v327_v52, %v311_v49 }
 0x474   :  { %v330_v55 = vsel %vm329_vm5, %v328_v54, %v325_v53 }
 0x475   :  { %v332_v56 = vsel %vm331_vm6, %v330_v55, 0.0 }
 0x476   :  { %333 = vst [vmem:[%s509_s7] sm:$0xff] %v332_v56 }

</bundles_post_ra>
